<compile_context>
chip_gen: v7x
topology: tpu7x:2x2x1
jax: 0.10.0
libtpu: 0.0.40
codegen_flags: <defaults>
</compile_context>

<pallas_src>
import math

import jax
import jax.numpy as jnp
from jax.experimental import pallas as pl
from jax.experimental.pallas import tpu as pltpu


def _bias_add_kernel(x_ref, b_ref, o_ref):
    # x_ref: (TM, TL) activation tile; b_ref: (TM, 1) resident per-row bias.
    # (TM, TL) + (TM, 1) broadcasts across the lane axis natively.
    o_ref[...] = x_ref[...] + b_ref[...]


def _round_up(x: int, m: int) -> int:
    return (x + m - 1) // m * m


def _cdiv(a: int, b: int) -> int:
    return -(-a // b)


def learnable_bias(x_nchw: jax.Array, bias: jax.Array) -> jax.Array:
    """x_nchw: (N, C, H, W); bias: (1, C, 1, 1) — same semantics as PyTorch module."""
    N, C, H, W = x_nchw.shape
    HW = H * W
    rows = N * C
    dtype = x_nchw.dtype
    itemsize = jnp.dtype(dtype).itemsize

    # Sublane packing multiple: 8 for 4-byte, 16 for 2-byte, 32 for 1-byte dtypes.
    sub_mult = max(8, 32 // itemsize)

    # Row-tile alignment: multiple of C (so one tiled bias column is valid for
    # every row tile) and of the sublane packing. If that exceeds the total
    # row count, use the full row extent (block dim == array dim is exempt
    # from the divisibility rule, and rows = N*C stays a multiple of C).
    m_align = math.lcm(C, sub_mult)
    if m_align > rows:
        m_align = rows

    x2d = x_nchw.reshape(rows, HW)

    # ---- tile sizing --------------------------------------------------------
    TARGET_TILE_BYTES = 4 * 1024 * 1024   # per x/out buffer (double-buffered)
    BIAS_VMEM_BYTES = 4 * 1024 * 1024     # cap on the lane-padded resident bias
    row_cap = max(m_align,
                  (BIAS_VMEM_BYTES // (128 * itemsize)) // m_align * m_align)

    full_row_bytes = HW * itemsize
    if m_align * full_row_bytes <= TARGET_TILE_BYTES:
        # Whole spatial extent per block (lane dim == full array dim, so no
        # 128-alignment requirement; ragged tails take masked stores).
        tl = HW
        tm = (TARGET_TILE_BYTES // (m_align * full_row_bytes)) * m_align
        tm = max(m_align, min(tm, row_cap))
        # Keep >= ~8 row tiles (when there are enough rows) so v7x's two
        # TensorCores both get work and the pipeline can double-buffer.
        rows_for_8 = _round_up(_cdiv(rows, 8), m_align)
        tm = max(m_align, min(tm, rows_for_8))
    else:
        # Minimum-aligned row tile; tile the lane (spatial) axis in multiples
        # of 128 to stay inside the VMEM budget for huge spatial sizes.
        tm = m_align
        tl = max(128, (TARGET_TILE_BYTES // (tm * itemsize)) // 128 * 128)
        tl = min(tl, _round_up(HW, 128))

    grid = (_cdiv(rows, tm), _cdiv(HW, tl))

    # Resident bias column: tm is a multiple of C, so row r of any row tile
    # needs bias[(r % C)] — one tiled (tm, 1) column serves every tile.
    # (Cast to activation dtype; see correctness note above.)
    b_col = jnp.tile(bias.reshape(C, 1).astype(dtype), (tm // C, 1))

    cost = pl.CostEstimate(
        flops=rows * HW,
        transcendentals=0,
        # activation read + write, plus the lane-padded resident bias fetch.
        bytes_accessed=2 * rows * HW * itemsize + tm * 128 * itemsize,
    )

    out2d = pl.pallas_call(
        _bias_add_kernel,
        out_shape=jax.ShapeDtypeStruct((rows, HW), dtype),
        grid_spec=pltpu.PrefetchScalarGridSpec(
            num_scalar_prefetch=0,
            grid=grid,
            in_specs=[
                pl.BlockSpec((tm, tl), lambda i, j: (i, j)),
                # Constant index_map -> DMA'd once, stays VMEM-resident.
                pl.BlockSpec((tm, 1), lambda i, j: (0, 0)),
            ],
            out_specs=pl.BlockSpec((tm, tl), lambda i, j: (i, j)),
        ),
        compiler_params=pltpu.CompilerParams(
            dimension_semantics=("parallel", "parallel"),
            vmem_limit_bytes=48 * 1024 * 1024,
        ),
        cost_estimate=cost,
    )(x2d, b_col)

    return out2d.reshape(N, C, H, W)


if __name__ == "__main__":
    key = jax.random.PRNGKey(0)
    kx, kb = jax.random.split(key)

    N, C, H, W = 2, 4, 16, 16
    x = jax.random.normal(kx, (N, C, H, W), dtype=jnp.float32)
    # Module initializes bias to zeros; use a deterministic non-zero value so
    # the broadcast path is actually exercised.
    bias = jax.random.normal(kb, (1, C, 1, 1), dtype=jnp.float32)

    out = learnable_bias(x, bias)
    jax.block_until_ready(out)

    # Reference check (plain JAX broadcasting, mirrors PyTorch expand_as + add).
    ref = x + bias
    assert out.shape == x.shape and out.dtype == x.dtype
    assert jnp.allclose(out, ref, atol=1e-6, rtol=1e-6)

    print("KERNEL_OK")
</pallas_src>

<mosaic_0001>
module attributes {stable_mosaic.version = 11 : i64} {
  func.func @_bias_add_kernel(%arg0: i32, %arg1: i32, %arg2: memref<8x256xf32, #tpu.memory_space<vmem>>, %arg3: memref<8x1xf32, #tpu.memory_space<vmem>>, %arg4: memref<8x256xf32, #tpu.memory_space<vmem>>) attributes {dimension_semantics = [#tpu.dimension_semantics<parallel>, #tpu.dimension_semantics<parallel>], iteration_bounds = array<i64: 1, 1>, scalar_prefetch = 0 : i64, scratch_operands = 0 : i64, tpu.core_type = #tpu.core_type<tc>, window_params = [{transform_indices = @transform_0, window_bounds = array<i64: 8, 256>}, {pipeline_mode = #tpu.pipeline_mode<synchronous>, transform_indices = @transform_1, window_bounds = array<i64: 8, 1>}, {transform_indices = @transform_2, window_bounds = array<i64: 8, 256>}]} {
    %c0 = arith.constant 0 : index
    %c0_0 = arith.constant 0 : index
    %0 = vector.load %arg2[%c0, %c0_0] : memref<8x256xf32, #tpu.memory_space<vmem>>, vector<8x256xf32>
    %c0_1 = arith.constant 0 : index
    %c0_2 = arith.constant 0 : index
    %1 = vector.load %arg3[%c0_1, %c0_2] : memref<8x1xf32, #tpu.memory_space<vmem>>, vector<8x1xf32>
    %2 = vector.broadcast %1 : vector<8x1xf32> to vector<8x256xf32>
    %3 = arith.addf %0, %2 : vector<8x256xf32>
    %c0_3 = arith.constant 0 : index
    %c0_4 = arith.constant 0 : index
    %4 = vector.load %arg4[%c0_3, %c0_4] : memref<8x256xf32, #tpu.memory_space<vmem>>, vector<8x256xf32>
    tpu.vector_store %arg4[%c0_3, %c0_4], %3 {strides = array<i32>} : memref<8x256xf32, #tpu.memory_space<vmem>>, vector<8x256xf32>,
    return
  }
  func.func @transform_0(%arg0: i32, %arg1: i32) -> (i32, i32) {
    %c0_i32 = arith.constant 0 : i32
    return %arg0, %arg1 : i32, i32
  }
  func.func @transform_1(%arg0: i32, %arg1: i32) -> (i32, i32) {
    %c0_i32 = arith.constant 0 : i32
    %c0_i32_0 = arith.constant 0 : i32
    %c0_i32_1 = arith.constant 0 : i32
    return %c0_i32, %c0_i32_0 : i32, i32
  }
  func.func @transform_2(%arg0: i32, %arg1: i32) -> (i32, i32) {
    %c0_i32 = arith.constant 0 : i32
    return %arg0, %arg1 : i32, i32
  }
}

</mosaic_0001>

<bundles_post_ra>
// kernel: tpu_custom_call.1
= control target key start
LH: loop header
LB: loop body
LE: loop exit
PB: predicated region body
PF: predicated region fallthrough
CT: control target
= control target key end

     0   :  { %7 = vsyncpa [#allocation3], 0  ;;  %s148_s0 = inlined_call_operand.hbm [shape: f32[8,256], index: 0, kind: input, shape index: {}]   ;;  %s149_s1 = inlined_call_operand.vmem [shape: f32[8,1], index: 1, kind: input, shape index: {}]   ;;  %s150_s2 = inlined_call_operand.hbm [shape: f32[8,256], index: 2, kind: output, shape index: {}]  }
   0x1   :  { %8 = vsyncpa [#allocation4], 0  ;;  %s103_s9 = smov [#allocation2]   ;;  %s55_s13 = scalar_lea.hbm %s148_s0, 256 }
   0x2   :  { %s15_s10 = sshll.u32 %s103_s9, 4  ;;  %p56_p0 = scmp.ne.s32.totalorder %s148_s0, %s55_s13  ;;  %s16_s10 = int_to_ptr.vmem [resolvable:$true] %s15_s10 }
   0x3   :  { %p59_p1 = scmp.lt.u32.totalorder %s55_s13, %s148_s0 }
   0x5   :  { %p61_p2 = pnand %p59_p1, %p56_p0 }
   0x7   :  { %64 = shalt.err (!%p61_p2)
}
   0x8   :  { %s65_s18 = scalar_lea.vmem %s16_s10, 256  ;;  %p70_p4 = scmp.lt.s32.totalorder %s16_s10, %s16_s10 }
   0x9   :  { %p66_p3 = scmp.ne.s32.totalorder %s16_s10, %s65_s18  ;;  %p71_p5 = scmp.lt.s32.totalorder %s65_s18, %s65_s18 }
   0xb   :  { %p72_p6 = por %p71_p5, %p70_p4 }
   0xd   :  { %p73_p7 = pnand %p72_p6, %p66_p3 }
   0xf   :  { %76 = shalt.err (!%p73_p7)
}
  0x10   :  { %18 = dma.hbm_to_vmem [thread:$0]  %s148_s0, 256, %s16_s10, [#allocation3]  }
  0x11   :  { %99 = dma.done.wait [#allocation3], 256  }
  0x12   :  { %100 = vsyncadd [#allocation3], 4294967040  ;;  %v104_v0 = vmov 0   ;;  %v26_v1 = vld [vmem:[%s149_s1] sm:$0xff]  ;;  %v25_v3 = vld [vmem:[#allocation2 + $0x8] sm:$0xff]  ;;  %s105_s23 = smov [#allocation5]  }
  0x13   :  { %54 = vset.pattern.permute.xlu0 %v104_v0  ;;  %v24_v2 = vld [vmem:[#allocation2] sm:$0xff]  ;;  %s42_s24 = sshll.u32 %s105_s23, 4  ;;  %s43_s24 = int_to_ptr.vmem [resolvable:$true] %s42_s24 }
  0x14   :  { %29 = vperm.xlu0 %54, %v26_v1   ;;  %s77_s0 = scalar_lea.vmem %s43_s24, 256  ;;  %p82_p9 = scmp.lt.s32.totalorder %s43_s24, %s43_s24 }
  0x15   :  { %p78_p8 = scmp.ne.s32.totalorder %s43_s24, %s77_s0  ;;  %p83_p10 = scmp.lt.s32.totalorder %s77_s0, %s77_s0 }
  0x17   :  { %p84_p11 = por %p83_p10, %p82_p9 }
  0x19   :  { %p85_p12 = pnand %p84_p11, %p78_p8 }
  0x93   :  { %v30_v4 = vpop.permute.xlu0 %29 }
  0x94   :  { %v32_v5 = vadd.f32 %v30_v4, %v24_v2  ;;  %v33_v6 = vadd.f32 %v30_v4, %v25_v3 }
  0x96   :  { %34 = vst [vmem:[#allocation5] sm:$0xff] %v32_v5  ;;  %35 = vst [vmem:[#allocation5 + $0x8] sm:$0xff] %v33_v6 }
  0x97   :  { %88 = shalt.err (!%p85_p12)
}
  0x98   :  { %s89_s26 = scalar_lea.hbm %s150_s2, 256 }
  0x99   :  { %p90_p13 = scmp.ne.s32.totalorder %s150_s2, %s89_s26  ;;  %p93_p0 = scmp.lt.u32.totalorder %s89_s26, %s150_s2 }
  0x9b   :  { %p95_p1 = pnand %p93_p0, %p90_p13 }
  0x9d   :  { %98 = shalt.err (!%p95_p1)
}
  0x9e   :  { %45 = dma.vmem_to_hbm [thread:$0]  %s43_s24, 256, %s150_s2, [#allocation4]  }
  0x9f   :  { %101 = dma.done.wait [#allocation4], 256  }
  0xa0   :  { %102 = vsyncadd [#allocation4], 4294967040 }
  0xa1   :  { %49 = vsyncpa [#allocation3], 1 }
  0xa2   :  { %50 = vsyncpa [#allocation4], 1 }

</bundles_post_ra>
